<compile_context>
chip_gen: v7x
topology: tpu7x:2x2x1
jax: 0.10.0
libtpu: 0.0.40
codegen_flags: <defaults>
</compile_context>

<pallas_src>
import math

import jax
import jax.numpy as jnp
from jax.experimental import pallas as pl
from jax.experimental.pallas import tpu as pltpu


def _round_up(x: int, m: int) -> int:
    return (x + m - 1) // m * m


# ----------------------- fused projection kernel (MXU) -----------------------

def _merge_matmul_kernel(a_ref, w_ref, b_ref, o_ref):
    # a_ref: (tm, K) unfolded-patch rows; w_ref: (K, N); b_ref: (1, N).
    acc = jnp.dot(a_ref[...], w_ref[...], preferred_element_type=jnp.float32)
    acc = acc + b_ref[...].astype(jnp.float32)
    o_ref[...] = acc.astype(o_ref.dtype)


def patch_merging_pallas(x, weight, bias, downscaling_factor, *, tile_rows=256):
    """x: [B, C, H, W]; weight: [N, K] (torch Linear layout, K = C*df^2);
    bias: [N].  Returns [B, H/df, W/df, N]."""
    B, C, H, W = x.shape
    df = downscaling_factor
    assert H % df == 0 and W % df == 0, "H, W must be divisible by df"
    Hn, Wn = H // df, W // df
    K = C * df * df
    N = weight.shape[0]
    assert weight.shape == (N, K)

    # nn.Unfold(k=df, stride=df) + permute: channel-major feature ordering
    # (c, kh, kw).  Pure reshape + transpose in XLA, feeding the fused kernel.
    a = x.reshape(B, C, Hn, df, Wn, df)
    a = a.transpose(0, 2, 4, 1, 3, 5)            # [B, Hn, Wn, C, df, df]
    a = a.reshape(B * Hn * Wn, K)                # rows x features

    R = a.shape[0]
    tm = min(tile_rows, _round_up(R, 8))         # big tiles; >= 8 sublanes
    pad = (-R) % tm
    if pad:                                      # only for ragged row counts
        a = jnp.pad(a, ((0, pad), (0, 0)))
    Rp = a.shape[0]

    w_t = weight.T                               # [K, N]: K on sublanes, N on lanes
    b2 = bias.reshape(1, N)

    flops = 2 * Rp * K * N
    bytes_accessed = 4 * (Rp * K + K * N + N + Rp * N)

    out = pl.pallas_call(
        _merge_matmul_kernel,
        out_shape=jax.ShapeDtypeStruct((Rp, N), x.dtype),
        grid_spec=pltpu.PrefetchScalarGridSpec(
            num_scalar_prefetch=0,
            grid=(Rp // tm,),
            in_specs=[
                pl.BlockSpec((tm, K), lambda i: (i, 0)),   # activation rows
                pl.BlockSpec((K, N), lambda i: (0, 0)),    # weight, VMEM-resident
                pl.BlockSpec((1, N), lambda i: (0, 0)),    # bias,   VMEM-resident
            ],
            out_specs=pl.BlockSpec((tm, N), lambda i: (i, 0)),
        ),
        compiler_params=pltpu.CompilerParams(
            dimension_semantics=("parallel",)),
        cost_estimate=pl.CostEstimate(
            flops=flops, transcendentals=0, bytes_accessed=bytes_accessed),
    )(a, w_t, b2)

    if pad:
        out = out[:R]
    return out.reshape(B, Hn, Wn, N)


# --------------------------------- module ------------------------------------

class PatchMerging:
    """JAX/Pallas equivalent of the PyTorch PatchMerging module
    (Unfold(df, stride=df) followed by Linear(C*df^2 -> out_channels))."""

    def __init__(self, in_channels, out_channels, downscaling_factor, key):
        self.downscaling_factor = downscaling_factor
        k_in = in_channels * downscaling_factor ** 2
        bound = 1.0 / math.sqrt(k_in)            # torch Linear default init range
        kw, kb = jax.random.split(key)
        self.weight = jax.random.uniform(kw, (out_channels, k_in), jnp.float32,
                                         -bound, bound)
        self.bias = jax.random.uniform(kb, (out_channels,), jnp.float32,
                                       -bound, bound)

    def __call__(self, x):
        return patch_merging_pallas(x, self.weight, self.bias,
                                    self.downscaling_factor)


# ------------------------------- reference -----------------------------------

def _reference_patch_merging(x, weight, bias, df):
    """Loop-based nn.Unfold + Linear reference (independent construction)."""
    B, C, H, W = x.shape
    cols = []
    for c in range(C):            # nn.Unfold feature order: c-major, then kh, kw
        for kh in range(df):
            for kw in range(df):
                cols.append(x[:, c, kh::df, kw::df])          # [B, H/df, W/df]
    unf = jnp.stack(cols, axis=-1)                            # [B, H', W', C*df^2]
    y = jnp.einsum("bhwk,nk->bhwn", unf, weight,
                   precision=jax.lax.Precision.HIGHEST) + bias
    return y


# ----------------------------------- main ------------------------------------

if __name__ == "__main__":
    key = jax.random.PRNGKey(0)

    # Config 1: lane-dense shapes (K = 32*2*2 = 128, N = 128).
    k1, k2, k3, k4 = jax.random.split(key, 4)
    B, C, H, W, df, Nout = 2, 32, 16, 16, 2, 128
    x = jax.random.normal(k1, (B, C, H, W), jnp.float32)
    pm = PatchMerging(C, Nout, df, k2)
    out = jax.block_until_ready(pm(x))
    ref = _reference_patch_merging(x, pm.weight, pm.bias, df)
    assert out.shape == (B, H // df, W // df, Nout)
    assert jnp.allclose(out, ref, atol=2e-3, rtol=2e-3), (
        "mismatch vs reference (config 1): %e" % float(jnp.max(jnp.abs(out - ref))))

    # Config 2: small / non-128-aligned path (df=4, K = 4*16 = 64, N = 96).
    B2, C2, H2, W2, df2, Nout2 = 2, 4, 16, 16, 4, 96
    x2 = jax.random.normal(k3, (B2, C2, H2, W2), jnp.float32)
    pm2 = PatchMerging(C2, Nout2, df2, k4)
    out2 = jax.block_until_ready(pm2(x2))
    ref2 = _reference_patch_merging(x2, pm2.weight, pm2.bias, df2)
    assert out2.shape == (B2, H2 // df2, W2 // df2, Nout2)
    assert jnp.allclose(out2, ref2, atol=2e-3, rtol=2e-3), (
        "mismatch vs reference (config 2): %e" % float(jnp.max(jnp.abs(out2 - ref2))))

    print("KERNEL_OK")
</pallas_src>

<mosaic_0001>
module attributes {stable_mosaic.version = 11 : i64} {
  func.func @_merge_matmul_kernel(%arg0: i32, %arg1: memref<128x128xf32, #tpu.memory_space<vmem>>, %arg2: memref<128x128xf32, #tpu.memory_space<vmem>>, %arg3: memref<1x128xf32, #tpu.memory_space<vmem>>, %arg4: memref<128x128xf32, #tpu.memory_space<vmem>>) attributes {dimension_semantics = [#tpu.dimension_semantics<parallel>], iteration_bounds = array<i64: 1>, scalar_prefetch = 0 : i64, scratch_operands = 0 : i64, tpu.core_type = #tpu.core_type<tc>, window_params = [{transform_indices = @transform_0, window_bounds = array<i64: 128, 128>}, {pipeline_mode = #tpu.pipeline_mode<synchronous>, transform_indices = @transform_1, window_bounds = array<i64: 128, 128>}, {pipeline_mode = #tpu.pipeline_mode<synchronous>, transform_indices = @transform_2, window_bounds = array<i64: 1, 128>}, {transform_indices = @transform_3, window_bounds = array<i64: 128, 128>}]} {
    %c0 = arith.constant 0 : index
    %c0_0 = arith.constant 0 : index
    %0 = vector.load %arg1[%c0, %c0_0] : memref<128x128xf32, #tpu.memory_space<vmem>>, vector<128x128xf32>
    %c0_1 = arith.constant 0 : index
    %c0_2 = arith.constant 0 : index
    %1 = vector.load %arg2[%c0_1, %c0_2] : memref<128x128xf32, #tpu.memory_space<vmem>>, vector<128x128xf32>
    %cst = arith.constant dense<0.000000e+00> : vector<128x128xf32>
    %2 = tpu.matmul %0, %1, %cst {dimension_numbers = #tpu.dot_dimension_numbers<[1], [0], [0], [1], [0, 0, 1, 1], [], []>} : vector<128x128xf32>, vector<128x128xf32>, vector<128x128xf32> -> vector<128x128xf32>
    %c0_3 = arith.constant 0 : index
    %c0_4 = arith.constant 0 : index
    %3 = vector.load %arg3[%c0_3, %c0_4] : memref<1x128xf32, #tpu.memory_space<vmem>>, vector<1x128xf32>
    %4 = vector.broadcast %3 : vector<1x128xf32> to vector<128x128xf32>
    %5 = arith.addf %2, %4 : vector<128x128xf32>
    %c0_5 = arith.constant 0 : index
    %c0_6 = arith.constant 0 : index
    %6 = vector.load %arg4[%c0_5, %c0_6] : memref<128x128xf32, #tpu.memory_space<vmem>>, vector<128x128xf32>
    tpu.vector_store %arg4[%c0_5, %c0_6], %5 {strides = array<i32>} : memref<128x128xf32, #tpu.memory_space<vmem>>, vector<128x128xf32>,
    return
  }
  func.func @transform_0(%arg0: i32) -> (i32, i32) {
    %c0_i32 = arith.constant 0 : i32
    %c0_i32_0 = arith.constant 0 : i32
    return %arg0, %c0_i32 : i32, i32
  }
  func.func @transform_1(%arg0: i32) -> (i32, i32) {
    %c0_i32 = arith.constant 0 : i32
    %c0_i32_0 = arith.constant 0 : i32
    %c0_i32_1 = arith.constant 0 : i32
    return %c0_i32, %c0_i32_0 : i32, i32
  }
  func.func @transform_2(%arg0: i32) -> (i32, i32) {
    %c0_i32 = arith.constant 0 : i32
    %c0_i32_0 = arith.constant 0 : i32
    %c0_i32_1 = arith.constant 0 : i32
    return %c0_i32, %c0_i32_0 : i32, i32
  }
  func.func @transform_3(%arg0: i32) -> (i32, i32) {
    %c0_i32 = arith.constant 0 : i32
    %c0_i32_0 = arith.constant 0 : i32
    return %arg0, %c0_i32 : i32, i32
  }
}

</mosaic_0001>

<bundles_post_ra>
// kernel: tpu_custom_call.1
= control target key start
LH: loop header
LB: loop body
LE: loop exit
PB: predicated region body
PF: predicated region fallthrough
CT: control target
= control target key end

     0   :  { %8 = vsyncpa [#allocation3], 0  ;;  %s548_s0 = inlined_call_operand.hbm [shape: f32[128,128], index: 0, kind: input, shape index: {}]   ;;  %s549_s1 = inlined_call_operand.hbm [shape: f32[128,128], index: 1, kind: input, shape index: {}]   ;;  %s550_s2 = inlined_call_operand.vmem [shape: f32[1,128], index: 2, kind: input, shape index: {}]   ;;  %s551_s3 = inlined_call_operand.hbm [shape: f32[128,128], index: 3, kind: output, shape index: {}]  }
   0x1   :  { %9 = vsyncpa [#allocation6], 0 }
   0x2   :  { %10 = vsyncpa [#allocation4], 0  ;;  %s475_s12 = smov [#allocation2]   ;;  %s403_s16 = scalar_lea.hbm %s548_s0, 2048 }
   0x3   :  { %s16_s13 = sshll.u32 %s475_s12, 4  ;;  %p404_p0 = scmp.ne.s32.totalorder %s548_s0, %s403_s16  ;;  %s17_s13 = int_to_ptr.vmem [resolvable:$true] %s16_s13 }
   0x4   :  { %p407_p1 = scmp.lt.u32.totalorder %s403_s16, %s548_s0 }
   0x6   :  { %p409_p2 = pnand %p407_p1, %p404_p0 }
   0x8   :  { %412 = shalt.err (!%p409_p2)
}
   0x9   :  { %s413_s21 = scalar_lea.vmem %s17_s13, 2048  ;;  %p418_p4 = scmp.lt.s32.totalorder %s17_s13, %s17_s13 }
   0xa   :  { %p414_p3 = scmp.ne.s32.totalorder %s17_s13, %s413_s21  ;;  %p419_p5 = scmp.lt.s32.totalorder %s413_s21, %s413_s21 }
   0xc   :  { %p420_p6 = por %p419_p5, %p418_p4 }
   0xe   :  { %p421_p7 = pnand %p420_p6, %p414_p3 }
  0x10   :  { %424 = shalt.err (!%p421_p7)
}
  0x11   :  { %s476_s22 = smov 128   ;;  %s477_s23 = smov 8  }
  0x12   :  { %22 = dma.hbm_to_vmem [thread:$0]  %s548_s0, 2048, %s17_s13, [#allocation3], %s476_s22, %s476_s22, %s477_s23  }
  0x13   :  { %s478_s26 = smov [#allocation5]   ;;  %s425_s30 = scalar_lea.hbm %s549_s1, 2048 }
  0x14   :  { %s28_s27 = sshll.u32 %s478_s26, 4  ;;  %p426_p8 = scmp.ne.s32.totalorder %s549_s1, %s425_s30  ;;  %s29_s27 = int_to_ptr.vmem [resolvable:$true] %s28_s27 }
  0x15   :  { %p429_p9 = scmp.lt.u32.totalorder %s425_s30, %s549_s1 }
  0x17   :  { %p431_p10 = pnand %p429_p9, %p426_p8 }
  0x19   :  { %434 = shalt.err (!%p431_p10)
}
  0x1a   :  { %s435_s8 = scalar_lea.vmem %s29_s27, 2048  ;;  %p440_p12 = scmp.lt.s32.totalorder %s29_s27, %s29_s27 }
  0x1b   :  { %p436_p11 = scmp.ne.s32.totalorder %s29_s27, %s435_s8  ;;  %p441_p13 = scmp.lt.s32.totalorder %s435_s8, %s435_s8 }
  0x1d   :  { %p442_p0 = por %p441_p13, %p440_p12 }
  0x1f   :  { %p443_p1 = pnand %p442_p0, %p436_p11 }
  0x21   :  { %446 = shalt.err (!%p443_p1)
}
  0x22   :  { %34 = dma.hbm_to_vmem [thread:$0]  %s549_s1, 2048, %s29_s27, [#allocation6], %s476_s22, %s476_s22, %s477_s23  }
  0x23   :  { %469 = dma.done.wait [#allocation3], 2048  }
  0x24   :  { %470 = vsyncadd [#allocation3], 4294965248 }
  0x25   :  { %471 = dma.done.wait [#allocation6], 2048  }
  0x26   :  { %472 = vsyncadd [#allocation6], 4294965248  ;;  %v59_v0 = vld [vmem:[#allocation5] sm:$0xff]  ;;  %v60_v1 = vld [vmem:[#allocation5 + $0x8] sm:$0xff] }
  0x27   :  { %v61_v2 = vld [vmem:[#allocation5 + $0x10] sm:$0xff]  ;;  %v350_v3 = vpack.c.bf16 %v60_v1, %v59_v0  ;;  %v62_v4 = vld [vmem:[#allocation5 + $0x18] sm:$0xff]  ;;  %v63_v6 = vld [vmem:[#allocation5 + $0x20] sm:$0xff] }
  0x28   :  { %v354_v5 = vpack.c.bf16 %v62_v4, %v61_v2  ;;  %v64_v7 = vld [vmem:[#allocation5 + $0x28] sm:$0xff]  ;;  %v43_v9 = vld [vmem:[#allocation2] sm:$0xff]  ;;  %v65_v11 = vld [vmem:[#allocation5 + $0x30] sm:$0xff] }
  0x29   :  { %351 = vmatprep.subr.bf16.mxu0 %v350_v3  ;;  %382 = vmatprep.subr.bf16.mxu1 %v350_v3  ;;  %v358_v8 = vpack.c.bf16 %v64_v7, %v63_v6  ;;  %v51_v10 = vld [vmem:[#allocation2 + $0x40] sm:$0xff]  ;;  %v66_v12 = vld [vmem:[#allocation5 + $0x38] sm:$0xff]  ;;  %v68_v15 = vld [vmem:[#allocation5 + $0x48] sm:$0xff] }
  0x2a   :  { %353 = vmatpush3.bf16.msra.mxu0 %v350_v3  ;;  %390 = vmatpush3.bf16.msra.mxu1 %v350_v3  ;;  %v362_v13 = vpack.c.bf16 %v66_v12, %v65_v11  ;;  %v67_v14 = vld [vmem:[#allocation5 + $0x40] sm:$0xff]  ;;  %v69_v17 = vld [vmem:[#allocation5 + $0x50] sm:$0xff]  ;;  %v70_v18 = vld [vmem:[#allocation5 + $0x58] sm:$0xff] }
  0x2b   :  { %355 = vmatprep.subr.bf16.mxu0 %v354_v5  ;;  %383 = vmatprep.subr.bf16.mxu1 %v354_v5  ;;  %v366_v16 = vpack.c.bf16 %v68_v15, %v67_v14  ;;  %v370_v19 = vpack.c.bf16 %v70_v18, %v69_v17  ;;  %v71_v20 = vld [vmem:[#allocation5 + $0x60] sm:$0xff]  ;;  %v72_v21 = vld [vmem:[#allocation5 + $0x68] sm:$0xff]  ;;  %v73_v23 = vld [vmem:[#allocation5 + $0x70] sm:$0xff] }
  0x2c   :  { %326 = vmatprep.mubr.f32.mxu0 %v43_v9  ;;  %338 = vmatprep.mubr.f32.mxu1 %v51_v10  ;;  %v374_v22 = vpack.c.bf16 %v72_v21, %v71_v20  ;;  %v74_v24 = vld [vmem:[#allocation5 + $0x78] sm:$0xff]  ;;  %v44_v26 = vld [vmem:[#allocation2 + $0x8] sm:$0xff]  ;;  %v45_v28 = vld [vmem:[#allocation2 + $0x10] sm:$0xff] }
  0x2d   :  { %v378_v25 = vpack.c.bf16 %v74_v24, %v73_v23  ;;  %v52_v27 = vld [vmem:[#allocation2 + $0x48] sm:$0xff]  ;;  %v53_v29 = vld [vmem:[#allocation2 + $0x50] sm:$0xff]  ;;  %v46_v30 = vld [vmem:[#allocation2 + $0x18] sm:$0xff] }
  0x2e   :  { %357 = vmatpush3.bf16.msra.mxu0 %v354_v5  ;;  %391 = vmatpush3.bf16.msra.mxu1 %v354_v5  ;;  %v54_v31 = vld [vmem:[#allocation2 + $0x58] sm:$0xff]  ;;  %v47_v32 = vld [vmem:[#allocation2 + $0x20] sm:$0xff]  ;;  %v48_v34 = vld [vmem:[#allocation2 + $0x28] sm:$0xff] }
  0x2f   :  { %359 = vmatprep.subr.bf16.mxu0 %v358_v8  ;;  %384 = vmatprep.subr.bf16.mxu1 %v358_v8  ;;  %v55_v33 = vld [vmem:[#allocation2 + $0x60] sm:$0xff]  ;;  %v56_v35 = vld [vmem:[#allocation2 + $0x68] sm:$0xff]  ;;  %v49_v36 = vld [vmem:[#allocation2 + $0x30] sm:$0xff] }
  0x30   :  { %v57_v37 = vld [vmem:[#allocation2 + $0x70] sm:$0xff]  ;;  %v50_v38 = vld [vmem:[#allocation2 + $0x38] sm:$0xff]  ;;  %v261_v40 = vld [vmem:[%s550_s2] ss:$0 sm:$0xff]  ;;  %s479_s2 = smov [#allocation7]  }
  0x31   :  { %v58_v39 = vld [vmem:[#allocation2 + $0x78] sm:$0xff]  ;;  %s248_s11 = sshll.u32 %s479_s2, 4  ;;  %s249_s11 = int_to_ptr.vmem [resolvable:$true] %s248_s11 }
  0x32   :  { %361 = vmatpush3.bf16.msra.mxu0 %v358_v8  ;;  %392 = vmatpush3.bf16.msra.mxu1 %v358_v8  ;;  %s447_s12 = scalar_lea.vmem %s249_s11, 2048  ;;  %p452_p3 = scmp.lt.s32.totalorder %s249_s11, %s249_s11 }
  0x33   :  { %363 = vmatprep.subr.bf16.mxu0 %v362_v13  ;;  %385 = vmatprep.subr.bf16.mxu1 %v362_v13  ;;  %p448_p2 = scmp.ne.s32.totalorder %s249_s11, %s447_s12  ;;  %p453_p4 = scmp.lt.s32.totalorder %s447_s12, %s447_s12 }
  0x35   :  { %p454_p5 = por %p453_p4, %p452_p3 }
  0x36   :  { %365 = vmatpush3.bf16.msra.mxu0 %v362_v13  ;;  %393 = vmatpush3.bf16.msra.mxu1 %v362_v13 }
  0x37   :  { %367 = vmatprep.subr.bf16.mxu0 %v366_v16  ;;  %386 = vmatprep.subr.bf16.mxu1 %v366_v16  ;;  %p455_p6 = pnand %p454_p5, %p448_p2 }
  0x3a   :  { %369 = vmatpush3.bf16.msra.mxu0 %v366_v16  ;;  %394 = vmatpush3.bf16.msra.mxu1 %v366_v16 }
  0x3b   :  { %371 = vmatprep.subr.bf16.mxu0 %v370_v19  ;;  %387 = vmatprep.subr.bf16.mxu1 %v370_v19 }
  0x3e   :  { %373 = vmatpush3.bf16.msra.mxu0 %v370_v19  ;;  %395 = vmatpush3.bf16.msra.mxu1 %v370_v19 }
  0x3f   :  { %375 = vmatprep.subr.bf16.mxu0 %v374_v22  ;;  %388 = vmatprep.subr.bf16.mxu1 %v374_v22 }
  0x42   :  { %377 = vmatpush3.bf16.msra.mxu0 %v374_v22  ;;  %396 = vmatpush3.bf16.msra.mxu1 %v374_v22 }
  0x43   :  { %379 = vmatprep.subr.bf16.mxu0 %v378_v25  ;;  %389 = vmatprep.subr.bf16.mxu1 %v378_v25 }
  0x46   :  { %381 = vmatpush3.bf16.msra.mxu0 %v378_v25  ;;  %397 = vmatpush3.bf16.msra.mxu1 %v378_v25 }
  0x49   :  { %327 = vmatmul.mubr.f32.vlgmr.msra.gmra.mrb[0].mxu0 %v44_v26  ;;  %339 = vmatmul.mubr.f32.vlgmr.msra.gmra.mrb[0].mxu1 %v52_v27 }
  0x4a   :  { %329 = vmatprep.mubr.f32.mxu0 %v45_v28  ;;  %341 = vmatprep.mubr.f32.mxu1 %v53_v29 }
  0x4d   :  { %330 = vmatmul.mubr.f32.gmra.mrb[2].mxu0 %v46_v30  ;;  %342 = vmatmul.mubr.f32.gmra.mrb[2].mxu1 %v54_v31 }
  0x4e   :  { %332 = vmatprep.mubr.f32.mxu0 %v47_v32  ;;  %344 = vmatprep.mubr.f32.mxu1 %v55_v33 }
  0x51   :  { %333 = vmatmul.mubr.f32.gmra.mrb[4].mxu0 %v48_v34  ;;  %345 = vmatmul.mubr.f32.gmra.mrb[4].mxu1 %v56_v35 }
  0x52   :  { %335 = vmatprep.mubr.f32.mxu0 %v49_v36  ;;  %347 = vmatprep.mubr.f32.mxu1 %v57_v37 }
  0x55   :  { %336 = vmatmul.mubr.f32.gmra.mrb[6].mxu0 %v50_v38  ;;  %348 = vmatmul.mubr.f32.gmra.mrb[6].mxu1 %v58_v39 }
 0x11c   :  { %v328_v41 = vpop.f32.mrb[0].mxu0  ;;  %v340_v42 = vpop.f32.mrb[0].mxu1 }
 0x11d   :  { %v154_v43 = vadd.f32 %v328_v41, %v261_v40  ;;  %v194_v44 = vadd.f32 %v340_v42, %v261_v40  ;;  %v148_v45 = vpop.f32.mrb[1].mxu0  ;;  %v188_v46 = vpop.f32.mrb[1].mxu1 }
 0x11e   :  { %v149_v47 = vadd.f32 %v261_v40, %v148_v45  ;;  %v189_v48 = vadd.f32 %v261_v40, %v188_v46 }
 0x11f   :  { %228 = vst [vmem:[#allocation7 + $0x8] sm:$0xff] %v154_v43  ;;  %236 = vst [vmem:[#allocation7 + $0x48] sm:$0xff] %v194_v44 }
 0x120   :  { %227 = vst [vmem:[#allocation7] sm:$0xff] %v149_v47  ;;  %235 = vst [vmem:[#allocation7 + $0x40] sm:$0xff] %v189_v48  ;;  %v331_v49 = vpop.f32.mrb[2].mxu0  ;;  %v343_v50 = vpop.f32.mrb[2].mxu1 }
 0x121   :  { %v164_v51 = vadd.f32 %v331_v49, %v261_v40  ;;  %v204_v52 = vadd.f32 %v343_v50, %v261_v40  ;;  %v158_v53 = vpop.f32.mrb[3].mxu0  ;;  %v198_v54 = vpop.f32.mrb[3].mxu1 }
 0x122   :  { %v159_v55 = vadd.f32 %v261_v40, %v158_v53  ;;  %v199_v56 = vadd.f32 %v261_v40, %v198_v54 }
 0x123   :  { %230 = vst [vmem:[#allocation7 + $0x18] sm:$0xff] %v164_v51  ;;  %238 = vst [vmem:[#allocation7 + $0x58] sm:$0xff] %v204_v52 }
 0x124   :  { %229 = vst [vmem:[#allocation7 + $0x10] sm:$0xff] %v159_v55  ;;  %237 = vst [vmem:[#allocation7 + $0x50] sm:$0xff] %v199_v56  ;;  %v334_v57 = vpop.f32.mrb[4].mxu0  ;;  %v346_v58 = vpop.f32.mrb[4].mxu1 }
 0x125   :  { %v174_v59 = vadd.f32 %v334_v57, %v261_v40  ;;  %v214_v60 = vadd.f32 %v346_v58, %v261_v40  ;;  %v168_v61 = vpop.f32.mrb[5].mxu0  ;;  %v208_v62 = vpop.f32.mrb[5].mxu1 }
 0x126   :  { %v169_v63 = vadd.f32 %v261_v40, %v168_v61  ;;  %v209_v0 = vadd.f32 %v261_v40, %v208_v62 }
 0x127   :  { %232 = vst [vmem:[#allocation7 + $0x28] sm:$0xff] %v174_v59  ;;  %240 = vst [vmem:[#allocation7 + $0x68] sm:$0xff] %v214_v60 }
 0x128   :  { %231 = vst [vmem:[#allocation7 + $0x20] sm:$0xff] %v169_v63  ;;  %239 = vst [vmem:[#allocation7 + $0x60] sm:$0xff] %v209_v0  ;;  %v337_v1 = vpop.f32.mrb[6].mxu0  ;;  %v349_v2 = vpop.f32.mrb[6].mxu1 }
 0x129   :  { %v184_v3 = vadd.f32 %v337_v1, %v261_v40  ;;  %v224_v4 = vadd.f32 %v349_v2, %v261_v40  ;;  %v178_v5 = vpop.f32.mrb[7].mxu0  ;;  %v218_v6 = vpop.f32.mrb[7].mxu1 }
 0x12a   :  { %v179_v7 = vadd.f32 %v261_v40, %v178_v5  ;;  %v219_v8 = vadd.f32 %v261_v40, %v218_v6 }
 0x12b   :  { %234 = vst [vmem:[#allocation7 + $0x38] sm:$0xff] %v184_v3  ;;  %242 = vst [vmem:[#allocation7 + $0x78] sm:$0xff] %v224_v4 }
 0x12c   :  { %233 = vst [vmem:[#allocation7 + $0x30] sm:$0xff] %v179_v7  ;;  %241 = vst [vmem:[#allocation7 + $0x70] sm:$0xff] %v219_v8 }
 0x12d   :  { %458 = shalt.err (!%p455_p6)
}
 0x12e   :  { %s459_s15 = scalar_lea.hbm %s551_s3, 2048 }
 0x12f   :  { %p460_p7 = scmp.ne.s32.totalorder %s551_s3, %s459_s15  ;;  %p463_p8 = scmp.lt.u32.totalorder %s459_s15, %s551_s3 }
 0x131   :  { %p465_p9 = pnand %p463_p8, %p460_p7 }
 0x133   :  { %468 = shalt.err (!%p465_p9)
}
 0x134   :  { %254 = dma.vmem_to_hbm [thread:$0]  %s249_s11, 2048, %s551_s3, [#allocation4], %s476_s22, %s476_s22, %s477_s23  }
 0x135   :  { %473 = dma.done.wait [#allocation4], 2048  }
 0x136   :  { %474 = vsyncadd [#allocation4], 4294965248 }
 0x137   :  { %258 = vsyncpa [#allocation3], 1 }
 0x138   :  { %259 = vsyncpa [#allocation6], 1 }
 0x139   :  { %260 = vsyncpa [#allocation4], 1 }

</bundles_post_ra>
